<compile_context>
chip_gen: v7x
topology: tpu7x:2x2x1
jax: 0.10.0
libtpu: 0.0.40
codegen_flags: <defaults>
</compile_context>

<pallas_src>
import functools

import jax
import jax.numpy as jnp
from jax.experimental import pallas as pl
from jax.experimental.pallas import tpu as pltpu


# ----------------------------------------------------------------------------
# Chip-aware budgets
# ----------------------------------------------------------------------------
def _vmem_limit_bytes():
    """~3/4 of physical VMEM, capped at 100 MiB, floored at 32 MiB."""
    try:
        cap = pltpu.get_tpu_info().vmem_capacity_bytes
    except Exception:
        cap = 64 * 1024 * 1024          # conservative (v7x-sized) fallback
    return max(min(int(cap * 3 // 4), 100 * 1024 * 1024), 32 * 1024 * 1024)


def _num_tensorcores():
    """2 TensorCores per chip on v7x; 1 on v5e/v6e."""
    try:
        kind = jax.devices()[0].device_kind
    except Exception:
        return 1
    return 2 if "7" in kind else 1


def _round_up(n, m):
    return ((n + m - 1) // m) * m


# ----------------------------------------------------------------------------
# Kernel 1: prefix projection  (B, clip_dim) @ (clip_dim, prefix_len*D) + b
#           tiled over the output dim so weight DMA overlaps the matmul.
# ----------------------------------------------------------------------------
def _proj_kernel(x_ref, w_ref, b_ref, o_ref):
    o_ref[...] = (
        jnp.dot(x_ref[...], w_ref[...], preferred_element_type=jnp.float32)
        + b_ref[...]
    )


def _choose_cout_tile(cout, cin, vmem_limit):
    # biggest lane-dense tile whose double-buffered bf16 weight block fits well
    for cand in (2048, 1536, 1024, 512, 256, 128):
        if cout % cand == 0 and cout // cand >= 2:
            if 2 * cin * cand * 2 <= vmem_limit // 2:
                return cand
    return cout


def linear_project(x, w, b):
    """x: (B, Cin) bf16, w: (Cin, Cout) bf16, b: (1, Cout) f32 -> (B, Cout) f32."""
    B, Cin = x.shape
    Cout = w.shape[1]
    vmem_limit = _vmem_limit_bytes()
    tn = _choose_cout_tile(Cout, Cin, vmem_limit)
    return pl.pallas_call(
        _proj_kernel,
        out_shape=jax.ShapeDtypeStruct((B, Cout), jnp.float32),
        grid=(Cout // tn,),
        in_specs=[
            pl.BlockSpec((B, Cin), lambda j: (0, 0)),
            pl.BlockSpec((Cin, tn), lambda j: (0, j)),
            pl.BlockSpec((1, tn), lambda j: (0, j)),
        ],
        out_specs=pl.BlockSpec((B, tn), lambda j: (0, j)),
        compiler_params=pltpu.CompilerParams(
            dimension_semantics=("parallel",),
            vmem_limit_bytes=vmem_limit,
        ),
    )(x, w, b)


# ----------------------------------------------------------------------------
# Kernel 2: ALL pre-norm transformer layers fused in one pallas_call.
#           grid = (batch_split, num_layers); output block is the resident
#           activation accumulator (constant block index across the layer axis).
# ----------------------------------------------------------------------------
def _layernorm(x, gamma, beta, eps=1e-5):
    # two-pass statistics (matches torch LayerNorm numerics more closely)
    mean = jnp.mean(x, axis=-1, keepdims=True)
    xc = x - mean
    var = jnp.mean(xc * xc, axis=-1, keepdims=True)
    return xc * jax.lax.rsqrt(var + eps) * gamma + beta


def _fused_layers_kernel(
    x_ref,
    g1_ref, be1_ref,
    wq_ref, bq_ref,
    wkv_ref, bkv_ref,
    wp_ref, bp_ref,
    g2_ref, be2_ref,
    w1_ref, bm1_ref,
    w2_ref, bm2_ref,
    o_ref,
    *, num_heads, batch, seq, seq_real,
):
    layer = pl.program_id(1)

    @pl.when(layer == 0)
    def _():
        o_ref[...] = x_ref[...]

    x = o_ref[...]                         # (rows, D) f32, resident in VMEM
    rows, D = x.shape
    hd = D // num_heads

    # --- pre-norm multi-head self-attention (dense matmuls on all rows) ---
    h = _layernorm(x, g1_ref[0], be1_ref[0]).astype(jnp.bfloat16)
    # Wq / bq were pre-scaled by 1/sqrt(hd) in the wrapper (scale folded into q).
    q = jnp.dot(h, wq_ref[0], preferred_element_type=jnp.float32) + bq_ref[0]
    kv = jnp.dot(h, wkv_ref[0], preferred_element_type=jnp.float32) + bkv_ref[0]

    # cast once, then split K/V at a D-aligned lane boundary (free for D%128==0)
    q3 = q.astype(jnp.bfloat16).reshape(batch, seq, D)
    kv3 = kv.astype(jnp.bfloat16).reshape(batch, seq, 2 * D)
    k3 = kv3[:, :, :D]      # torch reshape(b,m,2,heads,hd)[:, :, 0]
    v3 = kv3[:, :, D:]      # ...[:, :, 1]

    # static key-side bias masking padded sequence positions out of the softmax
    if seq_real < seq:
        col = jax.lax.broadcasted_iota(jnp.int32, (1, seq), 1)
        key_bias = jnp.where(col < seq_real, 0.0, -1e30).astype(jnp.float32)
    else:
        key_bias = None

    # TODO(synk): fold heads into a single multi-batch-dim contraction
    # ('bnhd,bmhd->bhnm') once Mosaic supports >1 batch dim in dot_general;
    # the static unroll below sticks to single-batch-dim einsums that lower.
    head_outs = []
    for hh in range(num_heads):
        sl = slice(hh * hd, (hh + 1) * hd)
        s = jnp.einsum('bnd,bmd->bnm', q3[:, :, sl], k3[:, :, sl],
                       preferred_element_type=jnp.float32)
        if key_bias is not None:
            s = s + key_bias
        s = s - jnp.max(s, axis=-1, keepdims=True)
        p = jnp.exp(s)
        p = p * pl.reciprocal(jnp.sum(p, axis=-1, keepdims=True), approx=True)
        head_outs.append(
            jnp.einsum('bnm,bmd->bnd', p.astype(jnp.bfloat16), v3[:, :, sl],
                       preferred_element_type=jnp.float32))
    attn = jnp.concatenate(head_outs, axis=-1).reshape(rows, D)

    attn = (jnp.dot(attn.astype(jnp.bfloat16), wp_ref[0],
                    preferred_element_type=jnp.float32) + bp_ref[0])
    x = x + attn

    # --- pre-norm MLP (ReLU, hidden = mlp_ratio * D) ---
    h2 = _layernorm(x, g2_ref[0], be2_ref[0]).astype(jnp.bfloat16)
    m = jnp.dot(h2, w1_ref[0], preferred_element_type=jnp.float32) + bm1_ref[0]
    m = jnp.maximum(m, 0.0).astype(jnp.bfloat16)
    m = jnp.dot(m, w2_ref[0], preferred_element_type=jnp.float32) + bm2_ref[0]

    o_ref[...] = x + m                     # resident accumulator update


def prepare_layer_stack(layers, num_heads):
    """Stack per-layer params on a leading layer axis; weights -> bf16;
    fold 1/sqrt(head_dim) into the q projection."""
    D = layers[0]["wq"].shape[0]
    hd = D // num_heads
    scale = float(hd) ** -0.5
    stack = lambda key: jnp.stack([lp[key] for lp in layers], axis=0)
    return {
        "g1": stack("g1"), "be1": stack("be1"),
        "wq": (stack("wq") * scale).astype(jnp.bfloat16),
        "bq": stack("bq") * scale,
        "wkv": stack("wkv").astype(jnp.bfloat16),
        "bkv": stack("bkv"),
        "wp": stack("wp").astype(jnp.bfloat16),
        "bp": stack("bp"),
        "g2": stack("g2"), "be2": stack("be2"),
        "w1": stack("w1").astype(jnp.bfloat16),
        "bm1": stack("bm1"),
        "w2": stack("w2").astype(jnp.bfloat16),
        "bm2": stack("bm2"),
    }


def transformer_forward(seq, stacked, num_heads, *, seq_real):
    B, N, D = seq.shape
    L = stacked["wq"].shape[0]
    H = stacked["w1"].shape[2]
    BN = B * N
    x = seq.reshape(BN, D).astype(jnp.float32)

    vmem_limit = _vmem_limit_bytes()

    # Split the (independent) batch rows across TensorCores on 2-TC chips
    # (v7x). On 1-TC chips split stays 1 so weights are streamed exactly once.
    split = 2 if (_num_tensorcores() == 2 and B % 2 == 0) else 1
    rows = BN // split
    b_blk = B // split

    # If the double-buffered per-layer weight set would crowd VMEM, drop the
    # two largest (MLP) weight refs to single buffering.
    w_elems = D * D + D * 2 * D + D * D + D * H + H * D
    per_layer_w_bytes = 2 * w_elems * 2          # bf16, double-buffered
    act_bytes = 2 * rows * D * 4                 # x block + resident out block
    tight = per_layer_w_bytes + act_bytes > int(vmem_limit * 0.6)
    mlp_mode = pl.Buffered(1) if tight else None

    def wspec(last_two, pipeline_mode=None):
        if pipeline_mode is None:
            return pl.BlockSpec((1,) + last_two, lambda c, l: (l, 0, 0))
        return pl.BlockSpec((1,) + last_two, lambda c, l: (l, 0, 0),
                            pipeline_mode=pipeline_mode)

    act_spec = pl.BlockSpec((rows, D), lambda c, l: (c, 0))

    in_specs = [
        act_spec,                                    # activation (read at l==0)
        wspec((1, D)), wspec((1, D)),                # ln1 gamma / beta
        wspec((D, D)), wspec((1, D)),                # Wq (pre-scaled), bq
        wspec((D, 2 * D)), wspec((1, 2 * D)),        # Wkv, bkv
        wspec((D, D)), wspec((1, D)),                # Wproj, bproj
        wspec((1, D)), wspec((1, D)),                # ln2 gamma / beta
        wspec((D, H), mlp_mode), wspec((1, H)),      # W1, b1
        wspec((H, D), mlp_mode), wspec((1, D)),      # W2, b2
    ]
    out = pl.pallas_call(
        functools.partial(_fused_layers_kernel, num_heads=num_heads,
                          batch=b_blk, seq=N, seq_real=seq_real),
        out_shape=jax.ShapeDtypeStruct((BN, D), jnp.float32),
        grid=(split, L),
        in_specs=in_specs,
        out_specs=act_spec,
        compiler_params=pltpu.CompilerParams(
            dimension_semantics=("parallel", "arbitrary"),   # layers sequential
            vmem_limit_bytes=vmem_limit,
        ),
    )(
        x,
        stacked["g1"], stacked["be1"],
        stacked["wq"], stacked["bq"],
        stacked["wkv"], stacked["bkv"],
        stacked["wp"], stacked["bp"],
        stacked["g2"], stacked["be2"],
        stacked["w1"], stacked["bm1"],
        stacked["w2"], stacked["bm2"],
    )
    return out.reshape(B, N, D)


# ----------------------------------------------------------------------------
# TransformerMapper forward
# ----------------------------------------------------------------------------
def transformer_mapper_forward(x, params, *, prefix_len, num_heads):
    B = x.shape[0]
    const_len, D = params["const"].shape

    # Linear(clip_dim, prefix_len * gpt_dim), then view to (B, prefix_len, D)
    proj = linear_project(
        x.astype(jnp.bfloat16),
        params["lin_w"].astype(jnp.bfloat16),
        params["lin_b"],
    )
    proj = proj.reshape(B, prefix_len, D)

    # concat learnable const along the sequence axis (plain-JAX glue)
    const = jnp.broadcast_to(params["const"][None], (B, const_len, D))
    seq = jnp.concatenate([proj, const], axis=1)

    # pad sequence to a multiple of 8 so in-kernel reshapes are layout-free;
    # padded key positions are masked out of attention inside the kernel.
    n_real = prefix_len + const_len
    n_pad = _round_up(n_real, 8)
    if n_pad != n_real:
        seq = jnp.pad(seq, ((0, 0), (0, n_pad - n_real), (0, 0)))

    stacked = prepare_layer_stack(params["layers"], num_heads)
    seq = transformer_forward(seq, stacked, num_heads, seq_real=n_real)

    return seq[:, prefix_len:n_real]


# ----------------------------------------------------------------------------
# Deterministic parameter init (synthetic — shapes from the module __init__)
# ----------------------------------------------------------------------------
def init_params(key, prefix_len, clip_dim, gpt_dim, const_len, num_layers, mlp_ratio=2.0):
    keys = jax.random.split(key, 3 + num_layers)
    D = gpt_dim
    H = int(D * mlp_ratio)
    scale = 0.02

    params = {
        "const": jax.random.normal(keys[0], (const_len, D), jnp.float32),
        # stored as (in, out) so the kernel computes x @ W + b
        "lin_w": scale * jax.random.normal(keys[1], (clip_dim, prefix_len * D), jnp.float32),
        "lin_b": jnp.zeros((1, prefix_len * D), jnp.float32),
        "layers": [],
    }
    for li in range(num_layers):
        k = jax.random.split(keys[3 + li], 6)
        params["layers"].append({
            "g1": jnp.ones((1, D), jnp.float32),
            "be1": jnp.zeros((1, D), jnp.float32),
            "wq": scale * jax.random.normal(k[0], (D, D), jnp.float32),
            "bq": jnp.zeros((1, D), jnp.float32),
            "wkv": scale * jax.random.normal(k[1], (D, 2 * D), jnp.float32),
            "bkv": jnp.zeros((1, 2 * D), jnp.float32),
            "wp": scale * jax.random.normal(k[2], (D, D), jnp.float32),
            "bp": jnp.zeros((1, D), jnp.float32),
            "g2": jnp.ones((1, D), jnp.float32),
            "be2": jnp.zeros((1, D), jnp.float32),
            "w1": scale * jax.random.normal(k[3], (D, H), jnp.float32),
            "bm1": jnp.zeros((1, H), jnp.float32),
            "w2": scale * jax.random.normal(k[4], (H, D), jnp.float32),
            "bm2": jnp.zeros((1, D), jnp.float32),
        })
    return params


if __name__ == "__main__":
    # small config: prefix_len=8, clip_dim=32, gpt_dim=32, const_len=10
    # (N=18 exercises the padding+mask path), attn_heads=4, num_layers=2, batch=2
    prefix_len, clip_dim, gpt_dim, const_len = 8, 32, 32, 10
    attn_heads, num_layers, batch = 4, 2, 2

    key = jax.random.PRNGKey(0)
    kx, kp = jax.random.split(key)
    x = jax.random.normal(kx, (batch, clip_dim), jnp.float32)
    params = init_params(kp, prefix_len, clip_dim, gpt_dim, const_len, num_layers)

    out = transformer_mapper_forward(
        x, params, prefix_len=prefix_len, num_heads=attn_heads
    )
    out = jax.block_until_ready(out)

    assert out.shape == (batch, const_len, gpt_dim), out.shape
    assert bool(jnp.all(jnp.isfinite(out)))
    print("KERNEL_OK")
</pallas_src>

<mosaic_0001>
module attributes {stable_mosaic.version = 11 : i64} {
  func.func @_proj_kernel(%arg0: i32, %arg1: memref<2x32xbf16, #tpu.memory_space<vmem>>, %arg2: memref<32x128xbf16, #tpu.memory_space<vmem>>, %arg3: memref<1x128xf32, #tpu.memory_space<vmem>>, %arg4: memref<2x128xf32, #tpu.memory_space<vmem>>) attributes {dimension_semantics = [#tpu.dimension_semantics<parallel>], iteration_bounds = array<i64: 2>, scalar_prefetch = 0 : i64, scratch_operands = 0 : i64, tpu.core_type = #tpu.core_type<tc>, window_params = [{pipeline_mode = #tpu.pipeline_mode<synchronous>, transform_indices = @transform_0, window_bounds = array<i64: 2, 32>}, {transform_indices = @transform_1, window_bounds = array<i64: 32, 128>}, {transform_indices = @transform_2, window_bounds = array<i64: 1, 128>}, {transform_indices = @transform_3, window_bounds = array<i64: 2, 128>}]} {
    %c0 = arith.constant 0 : index
    %c0_0 = arith.constant 0 : index
    %0 = vector.load %arg1[%c0, %c0_0] : memref<2x32xbf16, #tpu.memory_space<vmem>>, vector<2x32xbf16>
    %c0_1 = arith.constant 0 : index
    %c0_2 = arith.constant 0 : index
    %1 = vector.load %arg2[%c0_1, %c0_2] : memref<32x128xbf16, #tpu.memory_space<vmem>>, vector<32x128xbf16>
    %cst = arith.constant dense<0.000000e+00> : vector<2x128xf32>
    %2 = tpu.matmul %0, %1, %cst {dimension_numbers = #tpu.dot_dimension_numbers<[1], [0], [0], [1], [0, 0, 1, 1], [], []>} : vector<2x32xbf16>, vector<32x128xbf16>, vector<2x128xf32> -> vector<2x128xf32>
    %c0_3 = arith.constant 0 : index
    %c0_4 = arith.constant 0 : index
    %3 = vector.load %arg3[%c0_3, %c0_4] : memref<1x128xf32, #tpu.memory_space<vmem>>, vector<1x128xf32>
    %4 = vector.broadcast %3 : vector<1x128xf32> to vector<2x128xf32>
    %5 = arith.addf %2, %4 : vector<2x128xf32>
    %c0_5 = arith.constant 0 : index
    %c0_6 = arith.constant 0 : index
    %6 = vector.load %arg4[%c0_5, %c0_6] : memref<2x128xf32, #tpu.memory_space<vmem>>, vector<2x128xf32>
    tpu.vector_store %arg4[%c0_5, %c0_6], %5 {strides = array<i32>} : memref<2x128xf32, #tpu.memory_space<vmem>>, vector<2x128xf32>,
    return
  }
  func.func @transform_0(%arg0: i32) -> (i32, i32) {
    %c0_i32 = arith.constant 0 : i32
    %c0_i32_0 = arith.constant 0 : i32
    %c0_i32_1 = arith.constant 0 : i32
    return %c0_i32, %c0_i32_0 : i32, i32
  }
  func.func @transform_1(%arg0: i32) -> (i32, i32) {
    %c0_i32 = arith.constant 0 : i32
    %c0_i32_0 = arith.constant 0 : i32
    return %c0_i32, %arg0 : i32, i32
  }
  func.func @transform_2(%arg0: i32) -> (i32, i32) {
    %c0_i32 = arith.constant 0 : i32
    %c0_i32_0 = arith.constant 0 : i32
    return %c0_i32, %arg0 : i32, i32
  }
  func.func @transform_3(%arg0: i32) -> (i32, i32) {
    %c0_i32 = arith.constant 0 : i32
    %c0_i32_0 = arith.constant 0 : i32
    return %c0_i32, %arg0 : i32, i32
  }
}

</mosaic_0001>

<bundles_post_ra>
// kernel: tpu_custom_call.1
= control target key start
LH: loop header
LB: loop body
LE: loop exit
PB: predicated region body
PF: predicated region fallthrough
CT: control target
= control target key end

     0   :  { %8 = vsyncpa [#allocation3], 0  ;;  %s843_s0 = inlined_call_operand.hbm [shape: bf16[2,32], index: 0, kind: input, shape index: {}]   ;;  %s844_s1 = inlined_call_operand.hbm [shape: bf16[32,256], index: 1, kind: input, shape index: {}]   ;;  %s845_s2 = inlined_call_operand.vmem [shape: f32[1,256], index: 2, kind: input, shape index: {}]   ;;  %s846_s3 = inlined_call_operand.hbm [shape: f32[2,256], index: 3, kind: output, shape index: {}]  }
   0x1   :  { %9 = vsyncpa [#allocation6], 0 }
   0x2   :  { %11 = vsyncpa [#allocation6 + $0x1], 0 }
   0x3   :  { %12 = vsyncpa [#allocation4], 0 }
   0x4   :  { %14 = vsyncpa [#allocation4 + $0x1], 0  ;;  %s641_s12 = smov 0   ;;  %s643_s13 = smov 0  }
   0x5   :  { %s645_s14 = smov 0   ;;  %s647_s15 = smov 0  }
   0x6 LB: > { %s662_s16 = sadd.s32 4294967295, %s611_s15   ;;  %s390_s17 = sadd.s32 4294967294, %s611_s15   ;;  %s611_s15 = sphi %s647_s15, %s871_s15   ;;  %s607_s14 = sphi %s645_s14, %s870_s14   ;;  %s603_s13 = sphi %s643_s13, %s869_s13   ;;  %s599_s12 = sphi %s641_s12, %s868_s12  }
   0x7   : > { %s666_s18 = sadd.s32 1, %s611_s15   ;;  %s48_s19 = sadd.s32 1, %s607_s14 }
   0x8   : > { %s45_s20 = ssub.s32 %s611_s15, %s666_s18  ;;  %p55_p0 = scmp.ne.s32.totalorder %s607_s14, %s603_s13 }
   0x9   : > { %p46_p1 = scmp.eq.s32.totalorder %s45_s20, 0  ;;  %p56_p2 = scmp.eq.s32.totalorder %s611_s15, 0 }
   0xa   : > { %p61_p3 = scmp.ne.s32.totalorder %s603_s13, %s599_s12  ;;  %p847_p4 = scmp.eq.s32.totalorder %s662_s16, 0 }
   0xb   : > { %s678_s21 = scalar_select %p46_p1, %s607_s14, %s48_s19  }
   0xc   : > { %p680_p5 = por %p56_p2, %p55_p0  ;;  %p686_p6 = por %p847_p4, %p61_p3 }
   0xd   : > { %p111_p7 = scmp.eq.s32.totalorder %s662_s16, 1  ;;  %p117_p8 = scmp.eq.s32.totalorder %s390_s17, 1 }
   0xe   : > { %s853_s23 = scalar_select %p686_p6, 1, 0 }
   0xf   : > { %p391_p9 = scmp.ge.s32.totalorder %s611_s15, 1  ;;  %p124_p10 = scmp.lt.s32.totalorder %s611_s15, 3 }
  0x10   : > { %p693_p11 = por %p111_p7, %p55_p0  ;;  %p697_p12 = por %p117_p8, %p61_p3 }
  0x11   : > { %p701_p13 = pnand %p391_p9, %p124_p10  ;;  %s613_s27 = smov [#allocation2]  }
  0x12   : > { %s854_s24 = scalar_select %p693_p11, 1, 0 }
  0x13   : > { %s855_s25 = scalar_select %p697_p12, 1, 0 }
  0x14   : > { %s856_s26 = scalar_select %p701_p13, 1, 0 }
  0x15   : > { %p427_p2 = pneg %p701_p13  ;;  %s137_s28 = sshll.u32 %s613_s27, 4  ;;  %s138_s28 = int_to_ptr.vmem [resolvable:$true] %s137_s28 }
  0x16   : > { %p440_p4 = scmp.lt.s32.totalorder %s611_s15, 2  ;;  %p857_p0 = scmp.eq.s32.totalorder %s662_s16, 0 }
  0x17   : > { %s148_s30 = sand.u32 1, %s607_s14   ;;  %s483_s8 = scalar_lea.hbm %s843_s0, 16 }
  0x18   : > { %p711_p7 = pnand %p427_p2, %p857_p0  ;;  %p718_p3 = pnand %p440_p4, %p680_p5 }
  0x19   : > { %s394_s5 = sshll.u32 %s148_s30, 4  ;;  %p484_p8 = scmp.ne.s32.totalorder %s843_s0, %s483_s8 }
  0x1a   : > { %s859_s4 = scalar_select %p718_p3, 1, 0 }
  0x1b   : > { %p485_p9 = pneg %p711_p7  ;;  %p490_p4 = scmp.lt.u32.totalorder %s483_s8, %s843_s0 }
  0x1d   : > { %p486_p10 = pnand %p485_p9, %p484_p8 }
  0x1f   : > { %p487_p2 = pneg %p486_p10 }
  0x21   : > { %p492_p5 = pnand %p490_p4, %p487_p2 }
  0x23   : > { %495 = shalt.err (!%p492_p5)
}
  0x24   : > { %s496_s19 = scalar_lea.vmem %s138_s28, 16  ;;  %s503_s20 = scalar_lea.vmem %s138_s28, 32 }
  0x25   : > { %p497_p0 = scmp.ne.s32.totalorder %s138_s28, %s496_s19  ;;  %p504_p11 = scmp.lt.s32.totalorder %s138_s28, %s138_s28 }
  0x26   : > { %p505_p6 = scmp.lt.s32.totalorder %s503_s20, %s496_s19 }
  0x27   : > { %p499_p1 = pnand %p497_p0, %p485_p9 }
  0x28   : > { %p506_p13 = por %p505_p6, %p504_p11 }
  0x29   : > { %p500_p12 = pneg %p499_p1 }
  0x2b   : > { %p507_p3 = pnand %p506_p13, %p500_p12 }
  0x2d   : > { %510 = shalt.err (!%p507_p3)
}
  0x2e   : > { %430 = dma.hbm_to_vmem [thread:$0]  (!%p711_p7), %s843_s0, 16, %s138_s28, [#allocation3]  }
  0x2f   : > { %s395_s6 = sshll.u32 %s611_s15, 6  ;;  %s152_s7 = scalar_lea.vmem [#allocation5], %s394_s5 }
  0x30   : > { %s158_s8 = sshll.u32 %s152_s7, 4  ;;  %s742_s11 = scalar_lea.hbm %s844_s1, %s395_s6  ;;  %s744_s8 = int_to_ptr.vmem [resolvable:$true] %s158_s8 }
  0x31   : > { %s746_s29 = scalar_lea.sflag [#allocation6], %s148_s30  ;;  %s511_s17 = scalar_lea.hbm %s742_s11, 256 }
  0x32   : > { %p512_p6 = scmp.ne.s32.totalorder %s742_s11, %s511_s17  ;;  %p860_p11 = scmp.ne.s32.totalorder %s859_s4, 0 }
  0x33   : > { %s516_s19 = scalar_lea.hbm %s844_s1, 512  ;;  %p517_p7 = scmp.lt.u32.totalorder %s742_s11, %s844_s1 }
  0x34   : > { %p513_p12 = pneg %p860_p11  ;;  %p518_p3 = scmp.lt.u32.totalorder %s516_s19, %s511_s17 }
  0x35   : > { %p520_p9 = scmp.lt.u32.totalorder %s511_s17, %s742_s11 }
  0x36   : > { %p514_p13 = pnand %p513_p12, %p512_p6  ;;  %p519_p8 = por %p518_p3, %p517_p7 }
  0x38   : > { %p515_p1 = pneg %p514_p13  ;;  %p521_p10 = por %p520_p9, %p519_p8 }
  0x3a   : > { %p522_p2 = pnand %p521_p10, %p515_p1 }
  0x3c   : > { %525 = shalt.err (!%p522_p2)
}
  0x3d   : > { %s526_s30 = scalar_lea.vmem %s744_s8, 256  ;;  %s614_s27 = smov [#allocation5]  }
  0x3e   : > { %p527_p4 = scmp.ne.s32.totalorder %s744_s8, %s526_s30  ;;  %s531_s6 = sshll.u32 %s614_s27, 4  ;;  %s532_s6 = int_to_ptr.vmem [resolvable:$false] %s531_s6 }
  0x3f   : > { %s533_s7 = scalar_lea.vmem %s532_s6, 512  ;;  %p534_p6 = scmp.lt.s32.totalorder %s744_s8, %s532_s6 }
  0x40   : > { %p529_p5 = pnand %p527_p4, %p513_p12  ;;  %p535_p13 = scmp.lt.s32.totalorder %s533_s7, %s526_s30 }
  0x42   : > { %p530_p0 = pneg %p529_p5  ;;  %p536_p7 = por %p535_p13, %p534_p6 }
  0x44   : > { %p537_p3 = pnand %p536_p7, %p530_p0 }
  0x46   : > { %540 = shalt.err (!%p537_p3)
}
  0x47   : > { %s615_s9 = smov 128   ;;  %s616_s10 = smov 64  }
  0x48   : > { %s617_s17 = smov 4   ;;  %p861_p12 = scmp.ne.s32.totalorder %s856_s26, 0 }
  0x49   : > { %434 = dma.hbm_to_vmem [thread:$0]  (!%p860_p11), %s742_s11, 256, %s744_s8, %s746_s29, %s615_s9, %s616_s10, %s617_s17  }
  0x4a   : > { %176 = sbr.rel (%p861_p12) target bundleno = 323 (0x143), region = 32  ;;  %p862_p1 = scmp.eq.s32.totalorder (!%p861_p12), %s662_s16, 0 }
  0x51   : > { %586 = dma.done.wait (%p862_p1), [#allocation3], 16   ;;  %p863_p8 = pmov %p862_p1 }
  0x52   : > { %s781_s28 = sand.u32 1, %s603_s13   ;;  %p864_p9 = scmp.ne.s32.totalorder %s853_s23, 0 }
  0x53   : > { %588 = vsyncadd (%p863_p8), [#allocation3], 4294967280  ;;  %s398_s5 = sshll.u32 %s781_s28, 4  ;;  %s183_s19 = scalar_lea.sflag [#allocation6], %s781_s28 }
  0x54   : > { %s186_s20 = scalar_lea.vmem [#allocation5], %s398_s5 }
  0x55   : > { %590 = dma.done.wait (%p864_p9), %s183_s19, 256  }
  0x56   : > { %592 = vsyncadd (%p864_p9), %s183_s19, 4294967040  ;;  %v618_v0 = vmov 0.0   ;;  %vm619_vm0 = vmmov 0   ;;  %v481_v1 = vld [vmem:[%s186_s20] sm:$0xff]   ;;  %v482_v2 = vld [vmem:[%s186_s20 + $0x8] sm:$0xff]   ;;  %vm240_vm1 = vcmask 261120  }
  0x57   : > { %411 = vmatprep.subr.bf16.mxu0 %v618_v0  ;;  %415 = vmatprep.mubr.msk.bf16.mxu0 %vm619_vm0, %v618_v0  ;;  %v216_v3 = vld [vmem:[#allocation2] sm:$0x1]  ;;  %p212_p11 = scmp.lt.s32.totalorder %s662_s16, 1  ;;  %s399_s26 = sshll.u32 %s781_s28, 1 }
  0x58   : > { %412 = vmatpush3.bf16.msra.mxu0 %v481_v1  ;;  %s405_s29 = sshll.u32 %s662_s16, 5  ;;  %s211_s22 = scalar_lea.vmem [#allocation7], %s399_s26 }
  0x59   : > { %413 = vmatprep.subr.bf16.mxu0 %v618_v0  ;;  %s213_s23 = scalar_select %p212_p11, %s662_s16, 1 }
  0x5a   : > { %s299_s30 = sshll.u32 %s211_s22, 4  ;;  %s799_s7 = scalar_lea.hbm %s846_s3, %s405_s29  ;;  %s801_s30 = int_to_ptr.vmem [resolvable:$true] %s299_s30 }
  0x5b   : > { %s214_s11 = scalar_lea.vmem %s845_s2, %s213_s23  ;;  %s286_s9 = scalar_lea.sflag [#allocation4], %s781_s28 }
  0x5c   : > { %414 = vmatpush3.bf16.msra.mxu0 %v482_v2  ;;  %v400_v4 = vld [vmem:[%s214_s11] ss:$0 sm:$0xff]  ;;  %s541_s16 = scalar_lea.vmem %s801_s30, 32  ;;  %p865_p2 = scmp.ne.s32.totalorder %s854_s24, 0 }
  0x5d   : > { %p542_p10 = scmp.ne.s32.totalorder %s801_s30, %s541_s16  ;;  %s620_s10 = smov [#allocation7]  }
  0x5e   : > { %s545_s17 = sshll.u32 %s620_s10, 4  ;;  %s546_s17 = int_to_ptr.vmem [resolvable:$false] %s545_s17 }
  0x5f   : > { %416 = vmatmul.mubr.msk.bf16.vlgmr.msra.gmra.mrb[0].mxu0 %vm240_vm1, %v216_v3  ;;  %p543_p4 = pnand %p542_p10, %p865_p2  ;;  %s547_s5 = scalar_lea.vmem %s546_s17, 64 }
  0x60   : > { %p548_p0 = scmp.lt.s32.totalorder %s801_s30, %s546_s17  ;;  %p549_p6 = scmp.lt.s32.totalorder %s547_s5, %s541_s16 }
  0x61   : > { %p544_p5 = pneg %p543_p4 }
  0x62   : > { %p550_p13 = por %p549_p6, %p548_p0 }
  0x64   : > { %p551_p7 = pnand %p550_p13, %p544_p5 }
 0x132   : > { %v278_v5 = vpop.f32.mrb[0].mxu0 }
 0x133   : > { %v279_v6 = vadd.f32 %v400_v4, %v278_v5  ;;  %v417_v7 = vpop.f32.mrb[1].mxu0 }
 0x134   : > { %v281_v8 = vpop.f32.mrb[2].mxu0 }
 0x135   : > { %284 = vst [vmem:[%s211_s22] sm:$0x3] %v279_v6  ;;  %v418_v9 = vpop.f32.mrb[3].mxu0 }
 0x136   : > { %554 = shalt.err (!%p551_p7)
}
 0x137   : > { %s555_s28 = scalar_lea.hbm %s799_s7, 32  ;;  %s559_s23 = scalar_lea.hbm %s846_s3, 64 }
 0x138   : > { %p556_p3 = scmp.ne.s32.totalorder %s799_s7, %s555_s28  ;;  %p560_p8 = scmp.lt.u32.totalorder %s799_s7, %s846_s3 }
 0x139   : > { %p561_p9 = scmp.lt.u32.totalorder %s559_s23, %s555_s28  ;;  %p563_p10 = scmp.lt.u32.totalorder %s555_s28, %s799_s7 }
 0x13a   : > { %p557_p12 = pnand %p556_p3, %p865_p2 }
 0x13b   : > { %p562_p11 = por %p561_p9, %p560_p8 }
 0x13c   : > { %p558_p1 = pneg %p557_p12 }
 0x13d   : > { %p564_p4 = por %p563_p10, %p562_p11 }
 0x13f   : > { %p565_p5 = pnand %p564_p4, %p558_p1 }
 0x141   : > { %568 = shalt.err (!%p565_p5)
}
 0x142   : > { %425 = dma.vmem_to_hbm [thread:$0]  (%p865_p2), %s801_s30, 32, %s799_s7, %s286_s9  }
 0x143 PF: > { %s311_s8 = sand.u32 1, %s599_s12   ;;  %p866_p0 = scmp.ne.s32.totalorder %s855_s25, 0 }
 0x144   : > { %p867_p6 = scmp.ge.s32.totalorder %s611_s15, 2  ;;  %s312_s11 = scalar_lea.sflag [#allocation4], %s311_s8 }
 0x146   : > { %p436_p13 = pnand %p867_p6, %p866_p0 }
 0x148   : > { %594 = dma.done.wait (!%p436_p13), %s312_s11, 32  }
 0x149   : > { %596 = vsyncadd (!%p436_p13), %s312_s11, 4294967264  ;;  %p17_p7 = scmp.ge.s32.totalorder %s666_s18, 4   ;;  %s868_s12 = smov %s603_s13 }
 0x14a   : > { %s869_s13 = smov %s607_s14  ;;  %s870_s14 = smov %s678_s21 }
 0x14b   : > { %s871_s15 = smov %s666_s18  ;;  %19 = sbr.rel (!%p17_p7) target bundleno = 6 (0x6), region = 85 }
 0x152   :  { %317 = vsyncpa [#allocation3], 1 }
 0x153   :  { %319 = vsyncpa [#allocation3 + $0x1], 1 }
 0x154   :  { %320 = vsyncpa [#allocation6], 1 }
 0x155   :  { %322 = vsyncpa [#allocation6 + $0x1], 1 }
 0x156   :  { %323 = vsyncpa [#allocation4], 1 }
 0x157   :  { %325 = vsyncpa [#allocation4 + $0x1], 1 }

</bundles_post_ra>
